<compile_context>
chip_gen: v7x
topology: tpu7x:2x2x1
jax: 0.10.0
libtpu: 0.0.40
codegen_flags: <defaults>
</compile_context>

<pallas_src>
import functools
import math

import jax
import jax.numpy as jnp
from jax.experimental import pallas as pl
from jax.experimental.pallas import tpu as pltpu


def _xlogx(v):
    """v * log(v) with the 0*log(0) := 0 convention (trace-time Python float)."""
    return float(v * math.log(v)) if v > 0.0 else 0.0


def _round_up(a, b):
    return (a + b - 1) // b * b


def _label_smoothing_kernel(target_ref, colmask_ref, x_ref, loss_ref, *rest,
                            padding_idx, tile_v, confidence, smooth_val,
                            emit_td):
    if emit_td:
        td_ref, acc_ref = rest
    else:
        (acc_ref,) = rest

    j = pl.program_id(1)                       # V-tile index (reduction axis)

    x = x_ref[...].astype(jnp.float32)         # (tn, tv) log-probabilities
    tgt = target_ref[...]                      # (tn, 1) int32
    tn, tv = x.shape

    # Validity masks: column mask is precomputed in the wrapper (covers the
    # padding_idx column and out-of-range / ragged lanes); row mask is the
    # padding-row rule.  Padded / OOB rows carry target == padding_idx.
    col_valid = colmask_ref[...] != 0          # (1, tv)
    row_valid = tgt != padding_idx             # (tn, 1)
    valid = row_valid & col_valid              # (tn, tv)

    # Scatter positions: compare a local lane iota against the shifted target.
    tgt_local = tgt - j * tile_v               # (tn, 1)
    col_iota = jax.lax.broadcasted_iota(jnp.int32, (tn, tv), 1)
    is_tgt = col_iota == tgt_local

    base = jnp.where(is_tgt, jnp.float32(confidence), jnp.float32(smooth_val))

    if emit_td:
        td_ref[...] = jnp.where(valid, base, jnp.float32(0.0)).astype(td_ref.dtype)

    # Cross term sum(true_dist * x).  Mask the PRODUCT so garbage OOB lanes or
    # -inf log-probs at invalid positions can never poison the loss.
    xterm = jnp.where(valid, base * x, jnp.float32(0.0))
    partial = jnp.sum(xterm, axis=1, keepdims=True)      # (tn, 1)
    partial = jnp.sum(partial, axis=0, keepdims=True)    # (1, 1)

    @pl.when(j == 0)
    def _():
        acc_ref[...] = partial

    @pl.when(j > 0)
    def _():
        acc_ref[...] = acc_ref[...] + partial

    # Write the lane-dense loss block once per row tile (scalar at [0, 0]).
    @pl.when(j == pl.num_programs(1) - 1)
    def _():
        r = jax.lax.broadcasted_iota(jnp.int32, loss_ref.shape, 0)
        c = jax.lax.broadcasted_iota(jnp.int32, loss_ref.shape, 1)
        loss_ref[...] = jnp.where((r == 0) & (c == 0), acc_ref[...],
                                  jnp.float32(0.0))


def label_smoothing_loss(x, target, *, size, padding_idx, smoothing=0.0,
                         return_true_dist=True, max_tile_v=8192):
    """Returns (loss, true_dist_or_None) — matches LabelSmoothing.forward."""
    N, V = x.shape
    assert V == size
    assert size > 2, "label smoothing requires size > 2 (smoothing/(size-2))"
    assert max_tile_v % 128 == 0

    confidence = 1.0 - smoothing
    smooth_val = smoothing / (size - 2)

    # ---- tiling ------------------------------------------------------------
    if N >= 512:
        tile_n = 256
    elif N >= 16:
        tile_n = _round_up((N + 1) // 2, 8)   # >=2 row tiles -> both v7x TCs busy
    else:
        tile_n = N                            # tiny: single full-extent block
    tile_v = V if V <= max_tile_v else max_tile_v

    grid_n = pl.cdiv(N, tile_n)
    grid_v = pl.cdiv(V, tile_v)
    n_pad = grid_n * tile_n
    v_pad = grid_v * tile_v

    # Tiny side inputs only (a few KiB); x itself is never padded or copied.
    tgt = target.astype(jnp.int32).reshape(N, 1)
    if n_pad != N:
        tgt = jnp.pad(tgt, ((0, n_pad - N), (0, 0)), constant_values=padding_idx)
    col_ids = jnp.arange(v_pad, dtype=jnp.int32).reshape(1, v_pad)
    col_mask = ((col_ids != padding_idx) & (col_ids < V)).astype(jnp.int32)

    kernel = functools.partial(
        _label_smoothing_kernel,
        padding_idx=padding_idx,
        tile_v=tile_v,
        confidence=confidence,
        smooth_val=smooth_val,
        emit_td=return_true_dist,
    )

    out_shape = [jax.ShapeDtypeStruct((grid_n * 8, 128), jnp.float32)]
    out_specs = [pl.BlockSpec((8, 128), lambda i, j: (i, 0))]
    if return_true_dist:
        out_shape.append(jax.ShapeDtypeStruct((N, V), x.dtype))
        out_specs.append(pl.BlockSpec((tile_n, tile_v), lambda i, j: (i, j)))

    # VMEM budget derived from the actual double-buffered tile footprint.
    itemsize = jnp.dtype(x.dtype).itemsize
    x_tile = tile_n * tile_v * itemsize
    td_tile = x_tile if return_true_dist else 0
    small = 2 * (tile_n * 4 + tile_v * 4 + 8 * 128 * 4) + 8 * 1024
    vmem_limit = int(1.25 * (2 * x_tile + 2 * td_tile + small)) + (2 << 20)
    vmem_limit = max(16 * 1024 * 1024, min(vmem_limit, 96 * 1024 * 1024))

    outs = pl.pallas_call(
        kernel,
        out_shape=tuple(out_shape),
        grid=(grid_n, grid_v),
        in_specs=[
            pl.BlockSpec((tile_n, 1), lambda i, j: (i, 0)),       # target
            pl.BlockSpec((1, tile_v), lambda i, j: (0, j)),       # column validity
            pl.BlockSpec((tile_n, tile_v), lambda i, j: (i, j)),  # x (log-probs)
        ],
        out_specs=tuple(out_specs),
        scratch_shapes=[pltpu.VMEM((1, 1), jnp.float32)],
        compiler_params=pltpu.CompilerParams(
            dimension_semantics=("parallel", "arbitrary"),
            vmem_limit_bytes=vmem_limit,
        ),
    )(tgt, col_mask, x)

    if return_true_dist:
        loss_parts, true_dist = outs
    else:
        (loss_parts,) = outs
        true_dist = None

    # Analytic sum(td * log td): each valid (non-padding) row contributes
    # confidence*log(confidence) + (V-2)*smooth*log(smooth).
    n_valid = jnp.sum((target != padding_idx).astype(jnp.float32))
    xlogx_per_row = jnp.float32(_xlogx(confidence) + (size - 2) * _xlogx(smooth_val))
    cross = jnp.sum(loss_parts)                # sum(td * x) from the kernel
    loss = n_valid * xlogx_per_row - cross
    return loss, true_dist


if __name__ == "__main__":
    # Small deterministic example (exercises ragged row and column tiles).
    N, V = 20, 300
    padding_idx = 0
    smoothing = 0.1

    key = jax.random.PRNGKey(0)
    k_logits, k_tgt = jax.random.split(key)

    logits = jax.random.normal(k_logits, (N, V), dtype=jnp.float32)
    x = jax.nn.log_softmax(logits, axis=-1)          # KLDivLoss expects log-probs
    target = jax.random.randint(k_tgt, (N,), 0, V, dtype=jnp.int32)
    target = target.at[0].set(padding_idx)           # exercise padding-row mask
    target = target.at[3].set(padding_idx)

    # max_tile_v=128 forces several V tiles + a ragged last tile at small size.
    loss, true_dist = label_smoothing_loss(
        x, target, size=V, padding_idx=padding_idx, smoothing=smoothing,
        return_true_dist=True, max_tile_v=128)
    loss_fast, _ = label_smoothing_loss(
        x, target, size=V, padding_idx=padding_idx, smoothing=smoothing,
        return_true_dist=False, max_tile_v=128)
    jax.block_until_ready((loss, loss_fast, true_dist))

    # Pure-JAX reference (same semantics as the PyTorch module).
    td_ref = jnp.full((N, V), smoothing / (V - 2), dtype=jnp.float32)
    td_ref = td_ref.at[jnp.arange(N), target].set(1.0 - smoothing)
    td_ref = td_ref.at[:, padding_idx].set(0.0)
    td_ref = jnp.where((target == padding_idx)[:, None], 0.0, td_ref)
    log_td_ref = jnp.where(td_ref > 0,
                           jnp.log(jnp.where(td_ref > 0, td_ref, 1.0)), 0.0)
    loss_ref = jnp.sum(td_ref * log_td_ref - td_ref * x)

    assert jnp.allclose(true_dist, td_ref, atol=1e-6), "true_dist mismatch"
    assert jnp.allclose(loss, loss_ref, rtol=2e-5, atol=1e-3), "loss mismatch"
    assert jnp.allclose(loss_fast, loss, rtol=1e-6, atol=1e-5), "fast path mismatch"

    print("KERNEL_OK")
</pallas_src>

<mosaic_0001>
module attributes {stable_mosaic.version = 11 : i64} {
  func.func @_label_smoothing_kernel(%arg0: i32, %arg1: i32, %arg2: memref<16x1xi32, #tpu.memory_space<vmem>>, %arg3: memref<1x128xi32, #tpu.memory_space<vmem>>, %arg4: memref<16x128xf32, #tpu.memory_space<vmem>>, %arg5: memref<8x128xf32, #tpu.memory_space<vmem>>, %arg6: memref<16x128xf32, #tpu.memory_space<vmem>>, %arg7: memref<1x1xf32, #tpu.memory_space<vmem>>) attributes {dimension_semantics = [#tpu.dimension_semantics<parallel>, #tpu.dimension_semantics<arbitrary>], iteration_bounds = array<i64: 2, 3>, scalar_prefetch = 0 : i64, scratch_operands = 1 : i64, tpu.core_type = #tpu.core_type<tc>, window_params = [{transform_indices = @transform_0, window_bounds = array<i64: 16, 1>}, {transform_indices = @transform_1, window_bounds = array<i64: 1, 128>}, {transform_indices = @transform_2, window_bounds = array<i64: 16, 128>}, {transform_indices = @transform_3, window_bounds = array<i64: 8, 128>}, {transform_indices = @transform_4, window_bounds = array<i64: 16, 128>}]} {
    %c0 = arith.constant 0 : index
    %c0_0 = arith.constant 0 : index
    %0 = vector.load %arg4[%c0, %c0_0] : memref<16x128xf32, #tpu.memory_space<vmem>>, vector<16x128xf32>
    %c0_1 = arith.constant 0 : index
    %c0_2 = arith.constant 0 : index
    %1 = vector.load %arg2[%c0_1, %c0_2] : memref<16x1xi32, #tpu.memory_space<vmem>>, vector<16x1xi32>
    %c0_3 = arith.constant 0 : index
    %c0_4 = arith.constant 0 : index
    %2 = vector.load %arg3[%c0_3, %c0_4] : memref<1x128xi32, #tpu.memory_space<vmem>>, vector<1x128xi32>
    %c0_i32 = arith.constant 0 : i32
    %3 = vector.broadcast %c0_i32 : i32 to vector<1x128xi32>
    %4 = arith.cmpi ne, %2, %3 : vector<1x128xi32>
    %c0_i32_5 = arith.constant 0 : i32
    %5 = vector.broadcast %c0_i32_5 : i32 to vector<16x1xi32>
    %6 = arith.cmpi ne, %1, %5 : vector<16x1xi32>
    %7 = vector.broadcast %6 : vector<16x1xi1> to vector<16x128xi1>
    %8 = vector.broadcast %4 : vector<1x128xi1> to vector<16x128xi1>
    %9 = arith.andi %7, %8 : vector<16x128xi1>
    %c128_i32 = arith.constant 128 : i32
    %10 = arith.muli %arg1, %c128_i32 : i32
    %11 = vector.broadcast %10 : i32 to vector<16x1xi32>
    %12 = arith.subi %1, %11 : vector<16x1xi32>
    %13 = tpu.iota {dimensions = array<i32: 1>} : vector<16x128xi32>
    %14 = vector.broadcast %12 : vector<16x1xi32> to vector<16x128xi32>
    %15 = arith.cmpi eq, %13, %14 : vector<16x128xi32>
    %cst = arith.constant 0.899999976 : f32
    %cst_6 = arith.constant 3.35570483E-4 : f32
    %16 = vector.broadcast %cst : f32 to vector<16x128xf32>
    %17 = vector.broadcast %cst_6 : f32 to vector<16x128xf32>
    %18 = arith.select %15, %16, %17 : vector<16x128xi1>, vector<16x128xf32>
    %cst_7 = arith.constant 0.000000e+00 : f32
    %19 = vector.broadcast %cst_7 : f32 to vector<16x128xf32>
    %20 = arith.select %9, %18, %19 : vector<16x128xi1>, vector<16x128xf32>
    %c0_8 = arith.constant 0 : index
    %c0_9 = arith.constant 0 : index
    %21 = vector.load %arg6[%c0_8, %c0_9] : memref<16x128xf32, #tpu.memory_space<vmem>>, vector<16x128xf32>
    tpu.vector_store %arg6[%c0_8, %c0_9], %20 {strides = array<i32>} : memref<16x128xf32, #tpu.memory_space<vmem>>, vector<16x128xf32>,
    %22 = arith.mulf %18, %0 : vector<16x128xf32>
    %cst_10 = arith.constant 0.000000e+00 : f32
    %23 = vector.broadcast %cst_10 : f32 to vector<16x128xf32>
    %24 = arith.select %9, %22, %23 : vector<16x128xi1>, vector<16x128xf32>
    %cst_11 = arith.constant dense<0.000000e+00> : vector<16xf32>
    %25 = vector.multi_reduction <add>, %24, %cst_11 [1] : vector<16x128xf32> to vector<16xf32>
    %26 = vector.shape_cast %25 : vector<16xf32> to vector<16x1xf32>
    %cst_12 = arith.constant dense<0.000000e+00> : vector<1xf32>
    %27 = vector.multi_reduction <add>, %26, %cst_12 [0] : vector<16x1xf32> to vector<1xf32>
    %28 = vector.shape_cast %27 : vector<1xf32> to vector<1x1xf32>
    %c0_i32_13 = arith.constant 0 : i32
    %29 = arith.cmpi eq, %arg1, %c0_i32_13 : i32
    %30 = arith.extui %29 : i1 to i32
    %c0_i32_14 = arith.constant 0 : i32
    %31 = arith.cmpi ne, %30, %c0_i32_14 : i32
    scf.if %31 {
      %c0_18 = arith.constant 0 : index
      %c0_19 = arith.constant 0 : index
      %38 = vector.load %arg7[%c0_18, %c0_19] : memref<1x1xf32, #tpu.memory_space<vmem>>, vector<1x1xf32>
      tpu.vector_store %arg7[%c0_18, %c0_19], %28 {strides = array<i32>} : memref<1x1xf32, #tpu.memory_space<vmem>>, vector<1x1xf32>,
    } else {
    }
    %c0_i32_15 = arith.constant 0 : i32
    %32 = arith.cmpi sgt, %arg1, %c0_i32_15 : i32
    %33 = arith.extui %32 : i1 to i32
    %c0_i32_16 = arith.constant 0 : i32
    %34 = arith.cmpi ne, %33, %c0_i32_16 : i32
    scf.if %34 {
      %c0_18 = arith.constant 0 : index
      %c0_19 = arith.constant 0 : index
      %38 = vector.load %arg7[%c0_18, %c0_19] : memref<1x1xf32, #tpu.memory_space<vmem>>, vector<1x1xf32>
      %39 = arith.addf %38, %28 : vector<1x1xf32>
      %c0_20 = arith.constant 0 : index
      %c0_21 = arith.constant 0 : index
      %40 = vector.load %arg7[%c0_20, %c0_21] : memref<1x1xf32, #tpu.memory_space<vmem>>, vector<1x1xf32>
      tpu.vector_store %arg7[%c0_20, %c0_21], %39 {strides = array<i32>} : memref<1x1xf32, #tpu.memory_space<vmem>>, vector<1x1xf32>,
    } else {
    }
    %c2_i32 = arith.constant 2 : i32
    %35 = arith.cmpi eq, %arg1, %c2_i32 : i32
    %36 = arith.extui %35 : i1 to i32
    %c0_i32_17 = arith.constant 0 : i32
    %37 = arith.cmpi ne, %36, %c0_i32_17 : i32
    scf.if %37 {
      %38 = tpu.iota {dimensions = array<i32: 0>} : vector<8x128xi32>
      %39 = tpu.iota {dimensions = array<i32: 1>} : vector<8x128xi32>
      %c0_i32_18 = arith.constant 0 : i32
      %40 = vector.broadcast %c0_i32_18 : i32 to vector<8x128xi32>
      %41 = arith.cmpi eq, %38, %40 : vector<8x128xi32>
      %c0_i32_19 = arith.constant 0 : i32
      %42 = vector.broadcast %c0_i32_19 : i32 to vector<8x128xi32>
      %43 = arith.cmpi eq, %39, %42 : vector<8x128xi32>
      %44 = arith.andi %41, %43 : vector<8x128xi1>
      %c0_20 = arith.constant 0 : index
      %c0_21 = arith.constant 0 : index
      %45 = vector.load %arg7[%c0_20, %c0_21] : memref<1x1xf32, #tpu.memory_space<vmem>>, vector<1x1xf32>
      %cst_22 = arith.constant 0.000000e+00 : f32
      %46 = vector.shape_cast %45 : vector<1x1xf32> to vector<1x1xf32>
      %47 = vector.broadcast %46 : vector<1x1xf32> to vector<8x128xf32>
      %48 = vector.broadcast %cst_22 : f32 to vector<8x128xf32>
      %49 = arith.select %44, %47, %48 : vector<8x128xi1>, vector<8x128xf32>
      %c0_23 = arith.constant 0 : index
      %c0_24 = arith.constant 0 : index
      %50 = vector.load %arg5[%c0_23, %c0_24] : memref<8x128xf32, #tpu.memory_space<vmem>>, vector<8x128xf32>
      tpu.vector_store %arg5[%c0_23, %c0_24], %49 {strides = array<i32>} : memref<8x128xf32, #tpu.memory_space<vmem>>, vector<8x128xf32>,
    } else {
    }
    return
  }
  func.func @transform_0(%arg0: i32, %arg1: i32) -> (i32, i32) {
    %c0_i32 = arith.constant 0 : i32
    %c0_i32_0 = arith.constant 0 : i32
    return %arg0, %c0_i32 : i32, i32
  }
  func.func @transform_1(%arg0: i32, %arg1: i32) -> (i32, i32) {
    %c0_i32 = arith.constant 0 : i32
    %c0_i32_0 = arith.constant 0 : i32
    return %c0_i32, %arg1 : i32, i32
  }
  func.func @transform_2(%arg0: i32, %arg1: i32) -> (i32, i32) {
    %c0_i32 = arith.constant 0 : i32
    return %arg0, %arg1 : i32, i32
  }
  func.func @transform_3(%arg0: i32, %arg1: i32) -> (i32, i32) {
    %c0_i32 = arith.constant 0 : i32
    %c0_i32_0 = arith.constant 0 : i32
    return %arg0, %c0_i32 : i32, i32
  }
  func.func @transform_4(%arg0: i32, %arg1: i32) -> (i32, i32) {
    %c0_i32 = arith.constant 0 : i32
    return %arg0, %arg1 : i32, i32
  }
}

</mosaic_0001>

<bundles_post_ra>
// kernel: tpu_custom_call.1
= control target key start
LH: loop header
LB: loop body
LE: loop exit
PB: predicated region body
PF: predicated region fallthrough
CT: control target
= control target key end

     0   :  { %s1274_s0 = inlined_call_operand.vmem [shape: s32[32,1], index: 0, kind: input, shape index: {}]   ;;  %s1275_s1 = inlined_call_operand.vmem [shape: s32[1,384], index: 1, kind: input, shape index: {}]   ;;  %s1276_s2 = inlined_call_operand.hbm [shape: f32[20,300], index: 2, kind: input, shape index: {}]   ;;  %s1277_s3 = inlined_call_operand.hbm [shape: f32[16,128], index: 3, kind: output, shape index: {0}]   ;;  %s1278_s4 = inlined_call_operand.hbm [shape: f32[20,300], index: 4, kind: output, shape index: {1}]  }
   0x1   :  { %1284 = sst [smem:[#allocation19_spill]] %s1274_s0 }
   0x2   :  { %10 = vsyncpa [#allocation4], 0 }
   0x3   :  { %12 = vsyncpa [#allocation4 + $0x1], 0 }
   0x4   :  { %13 = vsyncpa [#allocation5], 0 }
   0x5   :  { %15 = vsyncpa [#allocation5 + $0x1], 0 }
   0x6   :  { %16 = vsyncpa [#allocation8], 0 }
   0x7   :  { %18 = vsyncpa [#allocation8 + $0x1], 0  ;;  %s944_s15 = smov 0   ;;  %s946_s16 = smov 0  }
   0x8   :  { %s948_s17 = smov 0   ;;  %s950_s18 = smov 0  }
   0x9   :  { %s952_s19 = smov 0   ;;  %s954_s20 = smov 0  }
   0xa   :  { %s956_s21 = smov 0   ;;  %s958_s22 = smov 0  }
   0xb   :  { %s960_s23 = smov 0   ;;  %s962_s24 = smov 0  }
   0xc   :  { %s964_s25 = smov 0  }
   0xd LB: > { %1285 = sst [smem:[#allocation12_spill]] %s873_s17  ;;  %s574_s26 = sadd.s32 4294967295, %s905_s25   ;;  %s905_s25 = sphi %s964_s25, %s24_s25   ;;  %s901_s24 = sphi %s962_s24, %s1308_s24   ;;  %s897_s23 = sphi %s960_s23, %s1314_s23   ;;  %s893_s22 = sphi %s958_s22, %s1306_s22   ;;  %s889_s21 = sphi %s956_s21, %s1313_s21   ;;  %s885_s20 = sphi %s954_s20, %s1305_s20   ;;  %s881_s19 = sphi %s952_s19, %s1312_s19   ;;  %s877_s18 = sphi %s950_s18, %s1311_s18   ;;  %s873_s17 = sphi %s948_s17, %s1303_s17   ;;  %s869_s16 = sphi %s946_s16, %s1310_s16   ;;  %s865_s15 = sphi %s944_s15, %s1309_s15  }
   0xe   : > { %1286 = sst [smem:[#allocation13_spill]] %s885_s20  ;;  %s575_s27 = sadd.s32 4294967294, %s905_s25  }
   0xf   : > { %1287 = sst [smem:[#allocation14_spill]] %s901_s24  ;;  %s33_s28 = sadd.s32 1, %s897_s23 }
  0x10   : > { %s36_s29 = sadd.s32 1, %s901_s24  ;;  %p34_p0 = scmp.ge.s32.totalorder %s33_s28, 3 }
  0x11   : > { %s97_s30 = sadd.s32 1, %s885_s20  ;;  %p104_p1 = scmp.ne.s32.totalorder %s885_s20, %s881_s19 }
  0x12   : > { %p105_p2 = scmp.eq.s32.totalorder %s905_s25, 0  ;;  %s1316_s28 = smov (%p34_p0, %s33_s28), 0 }
  0x13   : > { %1288 = sst [smem:[#allocation15_spill]] %s1316_s28  ;;  %s1318_s29 = smov (!%p34_p0, %s36_s29), %s901_s24 }
  0x14   : > { %s93_s5 = ssub.s32 %s897_s23, %s1316_s28  ;;  %p1015_p3 = por %p105_p2, %p104_p1 }
  0x15   : > { %p38_p4 = scmp.ge.s32.totalorder %s1318_s29, 2  ;;  %p110_p5 = scmp.ne.s32.totalorder %s881_s19, %s877_s18 }
  0x16   : > { %p111_p6 = scmp.eq.s32.totalorder %s574_s26, 0  ;;  %s123_s7 = sadd.s32 1, %s873_s17 }
  0x17   : > { %s1320_s29 = smov (%p38_p4, %s1318_s29), 0  ;;  %p133_p8 = scmp.ne.s32.totalorder %s873_s17, %s869_s16 }
  0x18   : > { %1290 = sst [smem:[#allocation16_spill]] %s1320_s29  ;;  %p1027_p7 = por %p111_p6, %p110_p5 }
  0x19   : > { %s92_s9 = ssub.s32 %s901_s24, %s1320_s29  ;;  %p134_p9 = scmp.eq.s32.totalorder %s574_s26, 5 }
  0x1a   : > { %s94_s10 = sor.u32 %s93_s5, %s92_s9  ;;  %p121_p10 = scmp.eq.s32.totalorder %s92_s9, 0 }
  0x1b   : > { %p95_p11 = scmp.eq.s32.totalorder %s94_s10, 0  ;;  %p1035_p12 = por %p134_p9, %p133_p8 }
  0x1c   : > { %s1040_s12 = scalar_select %p121_p10, %s873_s17, %s123_s7  }
  0x1d   : > { %s1043_s13 = scalar_select %p95_p11, %s885_s20, %s97_s30  }
  0x1e   : > { %1293 = sst [smem:[#allocation17_spill]] %s1040_s12  ;;  %p139_p13 = scmp.ne.s32.totalorder %s869_s16, %s865_s15 }
  0x1f   : > { %1294 = sst [smem:[#allocation18_spill]] %s1043_s13  ;;  %p140_p0 = scmp.eq.s32.totalorder %s575_s27, 5 }
  0x20   : > { %p1050_p2 = por %p134_p9, %p104_p1  ;;  %p577_p8 = scmp.ge.s32.totalorder %s905_s25, 6 }
  0x21   : > { %p1054_p4 = por %p140_p0, %p139_p13  ;;  %p1061_p6 = por %p140_p0, %p110_p5 }
  0x22   : > { %s1295_s14 = scalar_select %p1050_p2, 1, 0 }
  0x23   : > { %s1296_s26 = scalar_select %p1054_p4, 1, 0 }
  0x24   : > { %s1297_s5 = scalar_select %p1061_p6, 1, 0 }
  0x25   : > { %184 = sbr.rel (%p577_p8) target bundleno = 82 (0x52), region = 16 }
  0x2c   : > { %202 = sbr.rel (!%p1015_p3) target bundleno = 82 (0x52), region = 28  ;;  %s203_s27 = sand.u32 (%p1015_p3), 1, %s885_s20  }
  0x2d   : > { %s579_s30 = sshll.u32 (%p1015_p3), %s901_s24, 1  ;;  %s578_s7 = sshll.u32 (%p1015_p3), %s203_s27, 4 }
  0x2e   : > { %s209_s9 = ssub.s32 (%p1015_p3), 3, %s579_s30  ;;  %s1073_s28 = scalar_lea.sflag (%p1015_p3), [#allocation4], %s203_s27 }
  0x2f   : > { %p210_p1 = scmp.lt.s32.totalorder (%p1015_p3), %s209_s9, 2  ;;  %s207_s13 = scalar_lea.vmem (%p1015_p3), [#allocation3], %s578_s7 }
  0x33   : > { %s1322_s9 = smov (!%p210_p1, %s209_s9), 2 }
  0x34   : > { %s1070_s10 = sshll.u32 %s1322_s9, 7 }
  0x35   : > { %s214_s29 = ssub.s32 256, %s1070_s10 }
  0x36   : > { %215 = vsyncadd %s1073_s28, %s214_s29  ;;  %p581_p3 = scmp.ne.s32.totalorder %s1070_s10, 0  ;;  %s609_s6 = smul.u32 6, %s901_s24 }
  0x37   : > { %s222_s20 = sshll.u32 %s207_s13, 4  ;;  %s1079_s20 = int_to_ptr.vmem [resolvable:$true] %s222_s20 }
  0x38   : > { %s218_s30 = sadd.s32 %s897_s23, %s609_s6  ;;  %s727_s6 = scalar_lea.hbm %s1276_s2, 1152 }
  0x39   : > { %s583_s9 = sshll.u32 %s218_s30, 7 }
  0x3a   : > { %s1084_s27 = scalar_lea.hbm %s1276_s2, %s583_s9 }
  0x3b   : > { %s723_s29 = scalar_lea.hbm %s1084_s27, %s1070_s10  ;;  %p728_p11 = scmp.lt.u32.totalorder %s1084_s27, %s1276_s2 }
  0x3c   : > { %p724_p5 = scmp.ne.s32.totalorder %s1084_s27, %s723_s29  ;;  %p729_p13 = scmp.lt.u32.totalorder %s727_s6, %s723_s29 }
  0x3d   : > { %p731_p8 = scmp.lt.u32.totalorder %s723_s29, %s1084_s27 }
  0x3e   : > { %p725_p9 = pnand %p724_p5, %p581_p3  ;;  %p730_p0 = por %p729_p13, %p728_p11 }
  0x40   : > { %p726_p10 = pneg %p725_p9  ;;  %p732_p1 = por %p731_p8, %p730_p0 }
  0x42   : > { %p733_p6 = pnand %p732_p1, %p726_p10 }
  0x44   : > { %736 = shalt.err (!%p733_p6)
}
  0x45   : > { %s737_s17 = scalar_lea.vmem %s1079_s20, %s1070_s10  ;;  %s907_s12 = smov [#allocation3]  }
  0x46   : > { %p738_p5 = scmp.ne.s32.totalorder %s1079_s20, %s737_s17  ;;  %s741_s9 = sshll.u32 %s907_s12, 4  ;;  %s742_s9 = int_to_ptr.vmem [resolvable:$false] %s741_s9 }
  0x47   : > { %s743_s24 = scalar_lea.vmem %s742_s9, 512  ;;  %p744_p2 = scmp.lt.s32.totalorder %s1079_s20, %s742_s9 }
  0x48   : > { %p739_p9 = pnand %p738_p5, %p581_p3  ;;  %p745_p11 = scmp.lt.s32.totalorder %s743_s24, %s737_s17 }
  0x4a   : > { %p740_p4 = pneg %p739_p9  ;;  %p746_p13 = por %p745_p11, %p744_p2 }
  0x4c   : > { %p747_p0 = pnand %p746_p13, %p740_p4 }
  0x4e   : > { %750 = shalt.err (!%p747_p0)
}
  0x4f   : > { %s908_s29 = smov 384   ;;  %s909_s7 = smov 128  }
  0x50   : > { %s910_s13 = smov 8  }
  0x51   : > { %228 = dma.hbm_to_vmem [thread:$0]  (%p581_p3), %s1084_s27, %s1070_s10, %s1079_s20, %s1073_s28, %s908_s29, %s909_s7, %s910_s13  }
  0x52 PF: > { %p586_p6 = scmp.ge.s32.totalorder %s905_s25, 1  ;;  %p230_p10 = scmp.lt.s32.totalorder %s905_s25, 7 }
  0x54   : > { %p231_p8 = pnand %p586_p6, %p230_p10 }
  0x55   : > { %s1114_s6 = sand.u32 (!%p231_p8), 1, %s881_s19  }
  0x56   : > { %234 = sbr.rel (%p231_p8) target bundleno = 609 (0x261), region = 32  ;;  %s587_s30 = sshll.u32 (!%p231_p8), %s1114_s6, 4 }
  0x57   : > { %s237_s17 = scalar_lea.sflag (!%p231_p8), [#allocation4], %s1114_s6  ;;  %s1120_s12 = scalar_lea.vmem (!%p231_p8), [#allocation3], %s587_s30 }
  0x5d   : > { %852 = dma.done.wait (%p1027_p7), %s237_s17, 256  }
  0x5e   : > { %854 = vsyncadd (%p1027_p7), %s237_s17, 4294967040  ;;  %s1127_s20 = sshll.u32 %s893_s22, 1  ;;  %v911_v0 = vmov 0   ;;  %s592_s28 = sshll.u32 %s889_s21, 7  ;;  %v316_v8 = vlaneseq  ;;  %v297_v17 = vld [vmem:[%s1120_s12] sm:$0xff]  ;;  %v298_v24 = vld [vmem:[%s1120_s12 + $0x8] sm:$0xff] }
  0x5f   : > { %721 = vset.pattern.permute.xlu1 %v911_v0  ;;  %720 = vset.pattern.permute.xlu0 %v911_v0  ;;  %p279_p2 = scmp.lt.s32.totalorder %s1127_s20, 3  ;;  %v324_v1 = vstv %s592_s28  ;;  %s1298_s0 = sld [smem:[#allocation19_spill]]  ;;  %v912_v18 = vmov 0.00033557048  }
  0x60   : > { %p284_p7 = scmp.lt.s32.totalorder %s889_s21, 2  ;;  %v1140_v10 = vshrl.u32 %v316_v8, 7  ;;  %v328_v14 = vand.u32 127, %v316_v8  ;;  %s1147_s28 = scalar_lea.vmem [#allocation7], %s587_s30 }
  0x61   : > { %s280_s10 = scalar_select %p279_p2, %s1127_s20, 3 }
  0x62   : > { %s285_s29 = scalar_select %p284_p7, %s889_s21, 2  ;;  %v318_v11 = vsub.s32 0, %v1140_v10 }
  0x63   : > { %s591_s27 = sshll.u32 %s280_s10, 3  ;;  %s268_s10 = sand.u32 1, %s869_s16  }
  0x64   : > { %s286_s17 = scalar_lea.vmem %s1275_s1, %s285_s29  ;;  %s1156_s30 = sshll.u32 %s268_s10, 3 }
  0x65   : > { %s282_s8 = scalar_lea.vmem %s1298_s0, %s591_s27  ;;  %v301_v9 = vld [vmem:[%s286_s17] sm:$0x1]  ;;  %s270_s12 = scalar_lea.vmem [#allocation6], %s1156_s30 }
  0x66   : > { %v299_v2 = vld [vmem:[%s282_s8] sm:$0xff]  ;;  %v300_v3 = vld [vmem:[%s282_s8 + $0x8] sm:$0xff]  ;;  %vm302_vm2 = vcmp.ne.s32.totalorder %v301_v9, 0  ;;  %p593_p4 = scmp.ne.s32.totalorder %s889_s21, 0 }
  0x67   : > { %v325_v4 = vsub.s32 %v299_v2, %v324_v1  ;;  %vm303_vm0 = vcmp.ne.s32.totalorder %v299_v2, 0  ;;  %vm304_vm1 = vcmp.ne.s32.totalorder %v300_v3, 0  ;;  %v326_v6 = vsub.s32 %v300_v3, %v324_v1 }
  0x68   : > { %v305_v5 = vsel %vm303_vm0, 1, %v911_v0  ;;  %v306_v7 = vsel %vm304_vm1, 1, %v911_v0  ;;  %v315_v12 = vsel %vm302_vm2, 1, %v911_v0  ;;  %vm362_vm10 = vcmask (!%p593_p4), 0  }
  0x69   : > { %330 = vperm.xlu0 %720, %v325_v4   ;;  %308 = vperm.xlu1 %721, %v305_v5   ;;  %v319_v13 = vrot.slane %v315_v12, %v318_v11 }
  0x6b   : > { %vm320_vm3 = vcmp.eq.s32.totalorder %v319_v13, 1 }
  0x6d   : > { %333 = vperm.xlu0 %720, %v326_v6   ;;  %311 = vperm.xlu1 %721, %v306_v7  }
  0xe8   : > { %v331_v15 = vpop.permute.xlu0 %330  ;;  %v309_v16 = vpop.permute.xlu1 %308 }
  0xe9   : > { %vm335_vm4 = vcmp.eq.s32.totalorder %v328_v14, %v331_v15  ;;  %vm313_vm5 = vcmp.eq.s32.totalorder %v309_v16, 1 }
  0xea   : > { %v337_v19 = vsel %vm335_vm4, 0.9, %v912_v18  ;;  %vm321_vm6 = vmand %vm313_vm5, %vm320_vm3 }
  0xeb   : > { %v339_v20 = vsel %vm321_vm6, %v337_v19, 0.0  ;;  %v343_v21 = vmul.f32 %v337_v19, %v297_v17 }
  0xec   : > { %v334_v22 = vpop.permute.xlu0 %333  ;;  %v312_v23 = vpop.permute.xlu1 %311  ;;  %341 = vst [vmem:[%s1147_s28] sm:$0xff] %v339_v20 }
  0xed   : > { %vm336_vm7 = vcmp.eq.s32.totalorder %v328_v14, %v334_v22  ;;  %vm314_vm8 = vcmp.eq.s32.totalorder %v312_v23, 1  ;;  %v345_v25 = vsel %vm321_vm6, %v343_v21, 0.0 }
  0xee   : > { %v338_v26 = vsel %vm336_vm7, 0.9, %v912_v18  ;;  %347 = vadd.xlane.f32.xlu0 %v345_v25  ;;  %vm322_vm9 = vmand %vm314_vm8, %vm320_vm3 }
  0xef   : > { %v340_v27 = vsel %vm322_vm9, %v338_v26, 0.0  ;;  %v344_v28 = vmul.f32 %v338_v26, %v298_v24 }
  0xf0   : > { %342 = vst [vmem:[%s1147_s28 + $0x8] sm:$0xff] %v340_v27 }
  0xf1   : > { %v346_v29 = vsel %vm322_vm9, %v344_v28, 0.0 }
  0xf2   : > { %349 = vadd.xlane.f32.xlu1 %v346_v29 }
 0x17b   : > { %v348_v30 = vpop.xlane.xlu0 %347 }
 0x17f   : > { %v350_v31 = vpop.xlane.xlu1 %349 }
 0x180   : > { %v351_v32 = vadd.f32 %v350_v31, %v348_v30 }
 0x182   : > { %v352_v33 = vrot.slane %v351_v32, 4 }
 0x184   : > { %v353_v34 = vadd.f32 %v352_v33, %v351_v32 }
 0x186   : > { %v354_v35 = vrot.slane %v353_v34, 2  ;;  %361 = sbr.rel (%p593_p4) target bundleno = 399 (0x18f), region = 40 }
 0x188   : > { %v355_v36 = vadd.f32 %v354_v35, %v353_v34 }
 0x18a   : > { %v356_v37 = vrot.slane %v355_v36, 1 }
 0x18c   : > { %v357_v38 = vadd.f32 %v356_v37, %v355_v36 }
 0x18e   : > { %363 = vst.msk [vmem:[#allocation2] sm:$0x1] %vm362_vm10, %v357_v38 }
 0x18f PF: > { %p594_p3 = scmp.le.s32.totalorder %s889_s21, 0 }
 0x190   : > { %vm370_vm11 = vcmask (!%p594_p3), 0  }
 0x191   : > { %367 = sbr.rel (%p594_p3) target bundleno = 409 (0x199), region = 44 }
 0x195   : > { %v368_v39 = vld [vmem:[#allocation2] sm:$0x1] (!%p594_p3) }
 0x196   : > { %v369_v40 = vadd.f32 (!%p594_p3), %v368_v39, %v357_v38 }
 0x198   : > { %371 = vst.msk [vmem:[#allocation2] sm:$0x1] %vm370_vm11, %v369_v40 }
 0x199 PF: > { %p595_p1 = scmp.ne.s32.totalorder %s889_s21, 2 }
 0x19a   : > { %v913_v42 = vmov (!%p595_p1), 0   ;;  %vm378_vm12 = vcmp.eq.s32.totalorder (!%p595_p1), %v1140_v10, 0  ;;  %vm379_vm13 = vcmp.eq.s32.totalorder (!%p595_p1), %v328_v14, 0 }
 0x19b   : > { %375 = sbr.rel (%p595_p1) target bundleno = 546 (0x222), region = 48  ;;  %722 = vset.pattern.permute.xlu0 (!%p595_p1), %v913_v42  ;;  %vm380_vm14 = vmand (!%p595_p1), %vm378_vm12, %vm379_vm13 }
 0x19f   : > { %v596_v41 = vld [vmem:[#allocation2] ss:$0 sm:$0xff] (!%p595_p1) }
 0x1a0   : > { %388 = vperm.xlu0 (!%p595_p1), %722, %v596_v41  }
 0x21f   : > { %v389_v43 = vpop.permute.xlu0 %388 }
 0x220   : > { %v391_v44 = vsel %vm380_vm14, %v389_v43, 0.0 }
 0x221   : > { %392 = vst [vmem:[%s270_s12] sm:$0xff] %v391_v44 }
 0x222 PF: > { %s599_s27 = sshll.u32 %s893_s22, 7  ;;  %s412_s9 = sshll.u32 %s270_s12, 4  ;;  %s413_s9 = int_to_ptr.vmem [resolvable:$true] %s412_s9 }
 0x223   : > { %s1167_s29 = scalar_lea.hbm %s1277_s3, %s599_s27  ;;  %s394_s7 = scalar_lea.sflag [#allocation5], %s268_s10 }
 0x224   : > { %s751_s13 = scalar_lea.vmem %s413_s9, 128  ;;  %s914_s17 = smov [#allocation6]  }
 0x225   : > { %p752_p5 = scmp.ne.s32.totalorder %s413_s9, %s751_s13  ;;  %s755_s30 = sshll.u32 %s914_s17, 4  ;;  %s756_s30 = int_to_ptr.vmem [resolvable:$false] %s755_s30 }
 0x226   : > { %s757_s0 = scalar_lea.vmem %s756_s30, 256  ;;  %p758_p13 = scmp.lt.s32.totalorder %s413_s9, %s756_s30 }
 0x227   : > { %p753_p9 = pnand %p752_p5, %p1035_p12  ;;  %p759_p0 = scmp.lt.s32.totalorder %s757_s0, %s751_s13 }
 0x229   : > { %p754_p11 = pneg %p753_p9  ;;  %p760_p6 = por %p759_p0, %p758_p13 }
 0x22b   : > { %p761_p10 = pnand %p760_p6, %p754_p11 }
 0x22d   : > { %764 = shalt.err (!%p761_p10)
}
 0x22e   : > { %s765_s10 = scalar_lea.hbm %s1167_s29, 128  ;;  %s769_s24 = scalar_lea.hbm %s1277_s3, 256 }
 0x22f   : > { %p766_p8 = scmp.ne.s32.totalorder %s1167_s29, %s765_s10  ;;  %p770_p4 = scmp.lt.u32.totalorder %s1167_s29, %s1277_s3 }
 0x230   : > { %p771_p3 = scmp.lt.u32.totalorder %s769_s24, %s765_s10  ;;  %p773_p5 = scmp.lt.u32.totalorder %s765_s10, %s1167_s29 }
 0x231   : > { %p767_p2 = pnand %p766_p8, %p1035_p12 }
 0x232   : > { %p772_p1 = por %p771_p3, %p770_p4 }
 0x233   : > { %p768_p7 = pneg %p767_p2 }
 0x234   : > { %p774_p9 = por %p773_p5, %p772_p1 }
 0x236   : > { %p775_p11 = pnand %p774_p9, %p768_p7 }
 0x238   : > { %778 = shalt.err (!%p775_p11)
}
 0x239   : > { %612 = dma.vmem_to_hbm [thread:$0]  (%p1035_p12), %s413_s9, 128, %s1167_s29, %s394_s7  }
 0x23a   : > { %s399_s0 = scalar_lea.sflag [#allocation8], %s1114_s6  ;;  %p1299_p13 = scmp.ne.s32.totalorder %s1295_s14, 0 }
 0x23b   : > { %s420_s13 = ssub.s32 (%p1299_p13), 3, %s1127_s20 }
 0x23c   : > { %418 = sbr.rel (!%p1299_p13) target bundleno = 609 (0x261), region = 56  ;;  %p421_p0 = scmp.lt.s32.totalorder (%p1299_p13), %s420_s13, 2 }
 0x243   : > { %s1324_s13 = smov (!%p421_p0, %s420_s13), 2 }
 0x244   : > { %s1192_s30 = sshll.u32 %s1324_s13, 7 }
 0x245   : > { %s425_s10 = ssub.s32 256, %s1192_s30 }
 0x246   : > { %426 = vsyncadd %s399_s0, %s425_s10  ;;  %p602_p12 = scmp.ne.s32.totalorder %s1192_s30, 0  ;;  %s610_s11 = smul.u32 6, %s893_s22 }
 0x247   : > { %s433_s14 = sshll.u32 %s1147_s28, 4  ;;  %s915_s24 = smov [#allocation7]   ;;  %s1201_s14 = int_to_ptr.vmem [resolvable:$true] %s433_s14 }
 0x248   : > { %s429_s9 = sadd.s32 %s889_s21, %s610_s11  ;;  %s779_s27 = scalar_lea.vmem %s1201_s14, %s1192_s30 }
 0x249   : > { %s604_s20 = sshll.u32 %s429_s9, 7  ;;  %p780_p6 = scmp.ne.s32.totalorder %s1201_s14, %s779_s27 }
 0x24a   : > { %s1206_s12 = scalar_lea.hbm %s1278_s4, %s604_s20  ;;  %s783_s22 = sshll.u32 %s915_s24, 4  ;;  %s784_s22 = int_to_ptr.vmem [resolvable:$false] %s783_s22 }
 0x24b   : > { %p781_p10 = pnand %p780_p6, %p602_p12  ;;  %s785_s21 = scalar_lea.vmem %s784_s22, 512 }
 0x24c   : > { %p786_p2 = scmp.lt.s32.totalorder %s1201_s14, %s784_s22  ;;  %p787_p7 = scmp.lt.s32.totalorder %s785_s21, %s779_s27 }
 0x24d   : > { %p782_p8 = pneg %p781_p10 }
 0x24e   : > { %p788_p4 = por %p787_p7, %p786_p2 }
 0x250   : > { %p789_p3 = pnand %p788_p4, %p782_p8 }
 0x252   : > { %792 = shalt.err (!%p789_p3)
}
 0x253   : > { %s793_s28 = scalar_lea.hbm %s1206_s12, %s1192_s30  ;;  %s797_s13 = scalar_lea.hbm %s1278_s4, 1152 }
 0x254   : > { %p794_p1 = scmp.ne.s32.totalorder %s1206_s12, %s793_s28  ;;  %p798_p11 = scmp.lt.u32.totalorder %s1206_s12, %s1278_s4 }
 0x255   : > { %p799_p13 = scmp.lt.u32.totalorder %s797_s13, %s793_s28  ;;  %p801_p6 = scmp.lt.u32.totalorder %s793_s28, %s1206_s12 }
 0x256   : > { %p795_p5 = pnand %p794_p1, %p602_p12 }
 0x257   : > { %p800_p0 = por %p799_p13, %p798_p11 }
 0x258   : > { %p796_p9 = pneg %p795_p5 }
 0x259   : > { %p802_p10 = por %p801_p6, %p800_p0 }
 0x25b   : > { %p803_p8 = pnand %p802_p10, %p796_p9 }
 0x25d   : > { %806 = shalt.err (!%p803_p8)
}
 0x25e   : > { %s916_s9 = smov 128   ;;  %s917_s20 = smov 384  }
 0x25f   : > { %s918_s29 = smov 8  }
 0x260   : > { %439 = dma.vmem_to_hbm [thread:$0]  (%p602_p12), %s1201_s14, %s1192_s30, %s1206_s12, %s399_s0, %s916_s9, %s917_s20, %s918_s29  }
 0x261 PF: > { %p622_p2 = scmp.ge.s32.totalorder %s905_s25, 2  ;;  %s448_s7 = sand.u32 1, %s865_s15  }
 0x262   : > { %p1300_p7 = scmp.ne.s32.totalorder %s1296_s26, 0  ;;  %s449_s27 = scalar_lea.sflag [#allocation5], %s448_s7 }
 0x264   : > { %p616_p4 = pnand %p622_p2, %p1300_p7 }
 0x266   : > { %856 = dma.done.wait (!%p616_p4), %s449_s27, 128  }
 0x267   : > { %858 = vsyncadd (!%p616_p4), %s449_s27, 4294967168  ;;  %s457_s24 = sand.u32 1, %s877_s18   ;;  %p1301_p3 = scmp.ne.s32.totalorder %s1297_s5, 0 }
 0x268   : > { %s458_s22 = scalar_lea.sflag [#allocation8], %s457_s24 }
 0x269   : > { %p619_p1 = pnand %p622_p2, %p1301_p3 }
 0x26b   : > { %860 = dma.done.wait (!%p619_p1), %s458_s22, 256  }
 0x26c   : > { %862 = vsyncadd (!%p619_p1), %s458_s22, 4294967040  ;;  %s24_s25 = sadd.s32 1, %s905_s25   ;;  %s1302_s6 = sld [smem:[#allocation12_spill]] }
 0x26d   : > { %p21_p12 = scmp.ge.s32.totalorder %s24_s25, 8   ;;  %s1303_s17 = sld [smem:[#allocation17_spill]] }
 0x26e   : > { %s1304_s26 = sld [smem:[#allocation13_spill]]  ;;  %s1305_s20 = sld [smem:[#allocation18_spill]] }
 0x26f   : > { %s1306_s22 = sld [smem:[#allocation14_spill]]  ;;  %s1307_s0 = sld [smem:[#allocation15_spill]] }
 0x270   : > { %s1308_s24 = sld [smem:[#allocation16_spill]]  ;;  %s1309_s15 = smov %s869_s16 }
 0x271   : > { %s1311_s18 = smov %s881_s19  ;;  %s1313_s21 = smov %s897_s23 }
 0x272   : > { %s1310_s16 = smov %s1302_s6  ;;  %23 = sbr.rel (!%p21_p12) target bundleno = 13 (0xd), region = 112 }
 0x274   : > { %s1312_s19 = smov %s1304_s26 }
 0x275   : > { %s1314_s23 = smov %s1307_s0 }
 0x279   :  { %463 = vsyncpa [#allocation4], 1 }
 0x27a   :  { %465 = vsyncpa [#allocation4 + $0x1], 1 }
 0x27b   :  { %466 = vsyncpa [#allocation5], 1 }
 0x27c   :  { %468 = vsyncpa [#allocation5 + $0x1], 1 }
 0x27d   :  { %469 = vsyncpa [#allocation8], 1 }
 0x27e   :  { %471 = vsyncpa [#allocation8 + $0x1], 1 }

</bundles_post_ra>
